<compile_context>
chip_gen: v5e
topology: v5e:2x2
jax: 0.10.0
libtpu: 0.0.40
codegen_flags: <defaults>
</compile_context>

<pallas_src>
import functools
import math

import jax
import jax.numpy as jnp
import numpy as np
from jax.experimental import pallas as pl
from jax.experimental.pallas import tpu as pltpu

LANE = 128


# ---------------------------------------------------------------------------
# small helpers
# ---------------------------------------------------------------------------
def _round_up(x, m):
    return (x + m - 1) // m * m


def _pad2(a, rows, cols, dtype=None):
    dtype = a.dtype if dtype is None else dtype
    out = jnp.zeros((rows, cols), dtype)
    return out.at[:a.shape[0], :a.shape[1]].set(a.astype(dtype))


def _pad_row(v, cols):
    return jnp.zeros((1, cols), jnp.float32).at[0, :v.shape[0]].set(v)


def _full_spec(shape):
    # whole-array block; works with or without a grid
    return pl.BlockSpec(shape, lambda *_: (0,) * len(shape))


@functools.lru_cache(maxsize=None)
def _vmem_budget_bytes():
    """Scoped-VMEM budget: ~3/4 of physical, clamped to [32, 96] MiB.

    v7x has 64 MiB physical VMEM per TC (-> 48 MiB budget); v5e/v6e have
    128 MiB (-> 96 MiB budget).  Falls back to 48 MiB if the query fails.
    """
    cap = 64 * 1024 * 1024
    try:
        cap = int(pltpu.get_tpu_info().vmem_capacity_bytes)
    except Exception:
        pass
    return max(32 * 1024 * 1024, min(cap * 3 // 4, 96 * 1024 * 1024))


def _fused_max_nodes():
    # bf16 adjacency (Np^2 * 2 B) must fit the budget together with node
    # features, weights, both outputs and compiler temporaries.
    return 4096 if _vmem_budget_bytes() >= 80 * 1024 * 1024 else 2048


# ---------------------------------------------------------------------------
# Pallas kernels
# ---------------------------------------------------------------------------
def _gcn_fused_kernel(*refs, num_layers):
    """Entire GCN forward (all conv layers + output Linear) in one kernel.

    refs = [a, x, w_0..w_{L-1}, scale_0.., shift_0.., w_out, b_out, out, h]
    """
    L = num_layers
    a_ref, x_ref = refs[0], refs[1]
    w_refs = refs[2:2 + L]
    scale_refs = refs[2 + L:2 + 2 * L]
    shift_refs = refs[2 + 2 * L:2 + 3 * L]
    wout_ref = refs[2 + 3 * L]
    bout_ref = refs[3 + 3 * L]
    out_ref = refs[4 + 3 * L]
    h_ref = refs[5 + 3 * L]

    a = a_ref[...]                                   # bf16 adjacency, VMEM resident
    h = x_ref[...]                                   # f32 node features
    for l in range(L):                               # static unroll: L is compile-time
        xw = jnp.dot(h.astype(jnp.bfloat16), w_refs[l][...],
                     preferred_element_type=jnp.float32)
        agg = jnp.dot(a, xw.astype(jnp.bfloat16), preferred_element_type=jnp.float32)
        h = agg * scale_refs[l][...] + shift_refs[l][...]  # bias + eval-BN in one FMA
        if l < L - 1:
            h = jnp.maximum(h, 0.0)                  # ReLU (dropout = identity in eval)
    h_ref[...] = h.astype(h_ref.dtype)
    out_ref[...] = (jnp.dot(h.astype(jnp.bfloat16), wout_ref[...],
                            preferred_element_type=jnp.float32)
                    + bout_ref[...]).astype(out_ref.dtype)


def _xw_kernel(x_ref, w_ref, o_ref):
    """Feature transform X @ W for one row tile (bf16 in, bf16 out, f32 acc)."""
    o_ref[...] = jnp.dot(x_ref[...], w_ref[...],
                         preferred_element_type=jnp.float32).astype(o_ref.dtype)


def _agg_kernel(a_ref, xw_ref, scale_ref, shift_ref, o_ref, acc_ref, *, tk, relu):
    """Hidden layer aggregation: A[i,k] @ XW[k] accumulated over k.

    xw_ref is the FULL (Np, Cp) VMEM-resident array; the current K chunk is
    sliced in-kernel (no HBM re-streaming per row tile).
    """
    k = pl.program_id(1)

    @pl.when(k == 0)
    def _():
        acc_ref[...] = jnp.zeros_like(acc_ref)

    start = pl.multiple_of(k * tk, tk)
    acc_ref[...] += jnp.dot(a_ref[...], xw_ref[pl.ds(start, tk), :],
                            preferred_element_type=jnp.float32)

    @pl.when(k == pl.num_programs(1) - 1)
    def _():
        h = acc_ref[...] * scale_ref[...] + shift_ref[...]
        if relu:
            h = jnp.maximum(h, 0.0)
        o_ref[...] = h.astype(o_ref.dtype)


def _agg_out_kernel(a_ref, xw_ref, scale_ref, shift_ref, wout_ref, bout_ref,
                    out_ref, h_ref, acc_ref, *, tk):
    """Last-layer aggregation with the output Linear fused into the finalize step."""
    k = pl.program_id(1)

    @pl.when(k == 0)
    def _():
        acc_ref[...] = jnp.zeros_like(acc_ref)

    start = pl.multiple_of(k * tk, tk)
    acc_ref[...] += jnp.dot(a_ref[...], xw_ref[pl.ds(start, tk), :],
                            preferred_element_type=jnp.float32)

    @pl.when(k == pl.num_programs(1) - 1)
    def _():
        h = acc_ref[...] * scale_ref[...] + shift_ref[...]
        h_ref[...] = h.astype(h_ref.dtype)
        out_ref[...] = (jnp.dot(h.astype(jnp.bfloat16), wout_ref[...],
                                preferred_element_type=jnp.float32)
                        + bout_ref[...]).astype(out_ref.dtype)


# ---------------------------------------------------------------------------
# Wrappers
# ---------------------------------------------------------------------------
def _gcn_forward_fused(params, x, a_pad, Np):
    Cp, Op = params.c_pad, params.o_pad
    L = len(params.conv_w)
    x_p = _pad2(x, Np, Cp)                           # f32 node features

    inputs = ([a_pad, x_p] + list(params.w_pad) + list(params.scale_pad)
              + list(params.shift_pad) + [params.wout_pad, params.bout_pad])
    in_specs = ([_full_spec((Np, Np)), _full_spec((Np, Cp))]
                + [_full_spec((Cp, Cp))] * L
                + [_full_spec((1, Cp))] * (2 * L)
                + [_full_spec((Cp, Op)), _full_spec((1, Op))])

    flops = L * (2 * Np * Cp * Cp + 2 * Np * Np * Cp) + 2 * Np * Cp * Op
    bytes_accessed = (2 * Np * Np + 4 * Np * Cp + 2 * L * Cp * Cp + 2 * Cp * Op
                      + 4 * Np * (Cp + Op))

    out_p, h_p = pl.pallas_call(
        functools.partial(_gcn_fused_kernel, num_layers=L),
        out_shape=(jax.ShapeDtypeStruct((Np, Op), jnp.float32),
                   jax.ShapeDtypeStruct((Np, Cp), jnp.float32)),
        in_specs=in_specs,
        out_specs=(_full_spec((Np, Op)), _full_spec((Np, Cp))),
        compiler_params=pltpu.CompilerParams(vmem_limit_bytes=_vmem_budget_bytes()),
        cost_estimate=pl.CostEstimate(flops=flops, transcendentals=0,
                                      bytes_accessed=bytes_accessed),
    )(*inputs)
    return out_p, h_p


def _feature_transform(h_p, w_p, tm):
    Np, Cin = h_p.shape
    Cout = w_p.shape[1]
    return pl.pallas_call(
        _xw_kernel,
        out_shape=jax.ShapeDtypeStruct((Np, Cout), jnp.bfloat16),
        grid=(Np // tm,),
        in_specs=[pl.BlockSpec((tm, Cin), lambda i: (i, 0)),
                  pl.BlockSpec((Cin, Cout), lambda i: (0, 0))],
        out_specs=pl.BlockSpec((tm, Cout), lambda i: (i, 0)),
        compiler_params=pltpu.CompilerParams(
            dimension_semantics=("parallel",),
            vmem_limit_bytes=_vmem_budget_bytes()),
    )(h_p, w_p)


def _gcn_layer_tiled(a_pad, h_p, w_p, scale_p, shift_p, *, tm, tk, relu):
    Np = a_pad.shape[0]
    Cp = w_p.shape[1]
    xw = _feature_transform(h_p, w_p, tm)            # (Np, Cp) bf16
    return pl.pallas_call(
        functools.partial(_agg_kernel, tk=tk, relu=relu),
        out_shape=jax.ShapeDtypeStruct((Np, Cp), jnp.bfloat16),
        grid=(Np // tm, Np // tk),
        in_specs=[pl.BlockSpec((tm, tk), lambda i, k: (i, k)),
                  pl.BlockSpec((Np, Cp), lambda i, k: (0, 0)),   # resident XW
                  pl.BlockSpec((1, Cp), lambda i, k: (0, 0)),
                  pl.BlockSpec((1, Cp), lambda i, k: (0, 0))],
        out_specs=pl.BlockSpec((tm, Cp), lambda i, k: (i, 0)),
        scratch_shapes=[pltpu.VMEM((tm, Cp), jnp.float32)],
        compiler_params=pltpu.CompilerParams(
            dimension_semantics=("parallel", "arbitrary"),
            vmem_limit_bytes=_vmem_budget_bytes()),
        cost_estimate=pl.CostEstimate(flops=2 * Np * Np * Cp, transcendentals=0,
                                      bytes_accessed=2 * Np * Np + 6 * Np * Cp),
    )(a_pad, xw, scale_p, shift_p)


def _gcn_last_layer_tiled(a_pad, h_p, w_p, scale_p, shift_p, wout_p, bout_p, *, tm, tk):
    Np = a_pad.shape[0]
    Cp = w_p.shape[1]
    Op = wout_p.shape[1]
    xw = _feature_transform(h_p, w_p, tm)            # (Np, Cp) bf16
    out_p, hout_p = pl.pallas_call(
        functools.partial(_agg_out_kernel, tk=tk),
        out_shape=(jax.ShapeDtypeStruct((Np, Op), jnp.float32),
                   jax.ShapeDtypeStruct((Np, Cp), jnp.float32)),
        grid=(Np // tm, Np // tk),
        in_specs=[pl.BlockSpec((tm, tk), lambda i, k: (i, k)),
                  pl.BlockSpec((Np, Cp), lambda i, k: (0, 0)),   # resident XW
                  pl.BlockSpec((1, Cp), lambda i, k: (0, 0)),
                  pl.BlockSpec((1, Cp), lambda i, k: (0, 0)),
                  pl.BlockSpec((Cp, Op), lambda i, k: (0, 0)),
                  pl.BlockSpec((1, Op), lambda i, k: (0, 0))],
        out_specs=(pl.BlockSpec((tm, Op), lambda i, k: (i, 0)),
                   pl.BlockSpec((tm, Cp), lambda i, k: (i, 0))),
        scratch_shapes=[pltpu.VMEM((tm, Cp), jnp.float32)],
        compiler_params=pltpu.CompilerParams(
            dimension_semantics=("parallel", "arbitrary"),
            vmem_limit_bytes=_vmem_budget_bytes()),
        cost_estimate=pl.CostEstimate(
            flops=2 * Np * Np * Cp + 2 * Np * Cp * Op, transcendentals=0,
            bytes_accessed=2 * Np * Np + 4 * Np * Cp + 4 * Np * Op),
    )(a_pad, xw, scale_p, shift_p, wout_p, bout_p)
    return out_p, hout_p


# ---------------------------------------------------------------------------
# Planning / graph preprocessing (hoist out of repeated forward calls)
# ---------------------------------------------------------------------------
def plan_forward(num_nodes, *, force_tiled=False, tm=512, tk=1024):
    """Choose fused vs tiled path, padded node count and tile sizes."""
    n128 = _round_up(num_nodes, LANE)
    if not force_tiled and n128 <= _fused_max_nodes():
        return {"fused": True, "n_pad": n128, "tm": None, "tk": None}
    tm = max(LANE, min(_round_up(tm, LANE), n128))
    tk = max(LANE, min(_round_up(tk, LANE), n128))
    n_pad = _round_up(num_nodes, math.lcm(tm, tk))
    # v7x megacore: prefer >= 2 row tiles on the "parallel" axis when free.
    if n_pad // tm < 2 and (n_pad // 2) % LANE == 0:
        tm = n_pad // 2
    return {"fused": False, "n_pad": n_pad, "tm": tm, "tk": tk}


def pad_adjacency(a_hat, n_pad):
    """Zero-pad + cast to bf16. Pure preprocessing: compute once, reuse across calls."""
    return _pad2(a_hat, n_pad, n_pad, jnp.bfloat16)


# ---------------------------------------------------------------------------
# Parameters (plain JAX) + forward
# ---------------------------------------------------------------------------
def normalized_adjacency(edge_index, num_nodes):
    """Dense D^-1/2 (A + I) D^-1/2 as used by GCNConv (aggregation at target node)."""
    src, dst = edge_index[0], edge_index[1]
    A = jnp.zeros((num_nodes, num_nodes), jnp.float32)
    A = A.at[dst, src].add(1.0)                       # message src -> dst
    A = A + jnp.eye(num_nodes, dtype=jnp.float32)     # self loops
    deg = A.sum(axis=1)
    dinv = jnp.where(deg > 0, 1.0 / jnp.sqrt(deg), 0.0)
    return dinv[:, None] * A * dinv[None, :]


def glorot(key, shape):
    limit = jnp.sqrt(6.0 / (shape[0] + shape[1]))
    return jax.random.uniform(key, shape, jnp.float32, -limit, limit)


class GCNParams:
    def __init__(self, key, in_channels, hidden_dim, embedding_dim, output_dim,
                 num_layers, batchnorm=True, bn_eps=1e-5):
        assert num_layers >= 1, "num_layers must be >= 1"
        assert output_dim > 0, "output_dim must be > 0 (module's forward uses self.out)"
        if num_layers == 1:
            dims = [(in_channels, embedding_dim)]
        else:
            dims = ([(in_channels, hidden_dim)]
                    + [(hidden_dim, hidden_dim)] * (num_layers - 2)
                    + [(hidden_dim, embedding_dim)])

        keys = jax.random.split(key, len(dims) + 1)
        self.conv_w = [glorot(keys[i], d) for i, d in enumerate(dims)]
        self.conv_b = [jnp.zeros((d[1],), jnp.float32) for d in dims]
        self.out_w = glorot(keys[-1], (embedding_dim, output_dim))
        self.out_b = jnp.zeros((output_dim,), jnp.float32)
        self.batchnorm = batchnorm
        self.bn_eps = bn_eps
        self.embedding_dim = embedding_dim
        self.output_dim = output_dim

        # ---- lane-padded / folded parameters consumed by the kernels ----
        cmax = max([in_channels] + [d[1] for d in dims])
        self.c_pad = _round_up(cmax, LANE)
        self.o_pad = _round_up(output_dim, LANE)
        Cp, Op = self.c_pad, self.o_pad

        self.w_pad, self.scale_pad, self.shift_pad = [], [], []
        n_hidden = len(dims) - 1
        for l, (_, cout) in enumerate(dims):
            self.w_pad.append(_pad2(self.conv_w[l], Cp, Cp, jnp.bfloat16))
            if l < n_hidden and batchnorm:
                # eval-mode BN with reset running stats: mean=0, var=1, gamma=1, beta=0
                scale = jnp.full((cout,), 1.0 / jnp.sqrt(1.0 + bn_eps), jnp.float32)
                shift = jnp.zeros((cout,), jnp.float32)
            else:
                scale = jnp.ones((cout,), jnp.float32)
                shift = jnp.zeros((cout,), jnp.float32)
            # fold conv bias: (agg + b)*scale + shift = agg*scale + (scale*b + shift)
            shift = scale * self.conv_b[l] + shift
            self.scale_pad.append(_pad_row(scale, Cp))
            self.shift_pad.append(_pad_row(shift, Cp))
        self.wout_pad = _pad2(self.out_w, Cp, Op, jnp.bfloat16)
        self.bout_pad = _pad_row(self.out_b, Op)


def gcn_forward(params: GCNParams, x, a_pad, plan):
    """Forward pass. `a_pad` is the cached bf16 padded adjacency from pad_adjacency().

    Returns (out, h), matching the PyTorch module's eval-mode forward.
    """
    N = x.shape[0]
    Np = plan["n_pad"]
    assert a_pad.shape == (Np, Np) and a_pad.dtype == jnp.bfloat16
    L = len(params.conv_w)

    if plan["fused"]:
        out_p, h_p = _gcn_forward_fused(params, x, a_pad, Np)
    else:
        tm, tk = plan["tm"], plan["tk"]
        h_p = _pad2(x, Np, params.c_pad, jnp.bfloat16)       # bf16 inter-layer features
        for l in range(L - 1):
            h_p = _gcn_layer_tiled(a_pad, h_p, params.w_pad[l], params.scale_pad[l],
                                   params.shift_pad[l], tm=tm, tk=tk, relu=True)
        out_p, h_p = _gcn_last_layer_tiled(
            a_pad, h_p, params.w_pad[L - 1], params.scale_pad[L - 1],
            params.shift_pad[L - 1], params.wout_pad, params.bout_pad, tm=tm, tk=tk)

    return out_p[:N, :params.output_dim], h_p[:N, :params.embedding_dim]


def gcn_reference(params: GCNParams, x, a_hat):
    """Pure-JAX f32 reference (eval semantics) for correctness checking."""
    h = x
    L = len(params.conv_w)
    for l in range(L):
        h = a_hat @ (h @ params.conv_w[l]) + params.conv_b[l]
        if l < L - 1:
            if params.batchnorm:
                h = h * (1.0 / jnp.sqrt(1.0 + params.bn_eps))
            h = jnp.maximum(h, 0.0)
    out = h @ params.out_w + params.out_b
    return out, h


def ring_edges(n):
    fwd = jnp.arange(n, dtype=jnp.int32)
    nxt = (fwd + 1) % n
    return jnp.stack([jnp.concatenate([fwd, nxt]),
                      jnp.concatenate([nxt, fwd])], axis=0)   # (2, 2n)


# ---------------------------------------------------------------------------
if __name__ == "__main__":
    key = jax.random.PRNGKey(0)
    k_x1, k_x2, k_p = jax.random.split(key, 3)

    in_channels, hidden_dim, embedding_dim, output_dim = 16, 32, 32, 8
    num_layers = 3   # dropout is identity in eval mode

    params = GCNParams(k_p, in_channels, hidden_dim, embedding_dim, output_dim,
                       num_layers, batchnorm=True)

    # ---- small graph: fused single-kernel path (lane-dense, 128-padded) ----
    N1 = 48
    x1 = jax.random.normal(k_x1, (N1, in_channels), jnp.float32)
    a1 = normalized_adjacency(ring_edges(N1), N1)
    plan1 = plan_forward(N1)
    a1_pad = pad_adjacency(a1, plan1["n_pad"])        # hoisted/cached bf16 adjacency
    out1, h1 = gcn_forward(params, x1, a1_pad, plan1)
    jax.block_until_ready((out1, h1))
    assert out1.shape == (N1, output_dim) and h1.shape == (N1, embedding_dim)
    ref_out1, ref_h1 = gcn_reference(params, x1, a1)
    assert np.allclose(np.asarray(out1), np.asarray(ref_out1), rtol=5e-2, atol=5e-2)
    assert np.allclose(np.asarray(h1), np.asarray(ref_h1), rtol=5e-2, atol=5e-2)

    # ---- larger graph: tiled path (row x K grid, resident XW, f32 accumulator) ----
    N2 = 300
    x2 = jax.random.normal(k_x2, (N2, in_channels), jnp.float32)
    a2 = normalized_adjacency(ring_edges(N2), N2)
    plan2 = plan_forward(N2, force_tiled=True, tm=256, tk=128)   # small tiles to exercise the grid
    a2_pad = pad_adjacency(a2, plan2["n_pad"])
    out2, h2 = gcn_forward(params, x2, a2_pad, plan2)
    jax.block_until_ready((out2, h2))
    assert out2.shape == (N2, output_dim) and h2.shape == (N2, embedding_dim)
    ref_out2, ref_h2 = gcn_reference(params, x2, a2)
    assert np.allclose(np.asarray(out2), np.asarray(ref_out2), rtol=5e-2, atol=5e-2)
    assert np.allclose(np.asarray(h2), np.asarray(ref_h2), rtol=5e-2, atol=5e-2)

    print("KERNEL_OK")
</pallas_src>

<mosaic_0001>
module attributes {stable_mosaic.version = 11 : i64} {
  func.func @_gcn_fused_kernel(%arg0: memref<128x128xbf16, #tpu.memory_space<vmem>>, %arg1: memref<128x128xf32, #tpu.memory_space<vmem>>, %arg2: memref<128x128xbf16, #tpu.memory_space<vmem>>, %arg3: memref<128x128xbf16, #tpu.memory_space<vmem>>, %arg4: memref<128x128xbf16, #tpu.memory_space<vmem>>, %arg5: memref<1x128xf32, #tpu.memory_space<vmem>>, %arg6: memref<1x128xf32, #tpu.memory_space<vmem>>, %arg7: memref<1x128xf32, #tpu.memory_space<vmem>>, %arg8: memref<1x128xf32, #tpu.memory_space<vmem>>, %arg9: memref<1x128xf32, #tpu.memory_space<vmem>>, %arg10: memref<1x128xf32, #tpu.memory_space<vmem>>, %arg11: memref<128x128xbf16, #tpu.memory_space<vmem>>, %arg12: memref<1x128xf32, #tpu.memory_space<vmem>>, %arg13: memref<128x128xf32, #tpu.memory_space<vmem>>, %arg14: memref<128x128xf32, #tpu.memory_space<vmem>>) attributes {dimension_semantics = [], scalar_prefetch = 0 : i64, scratch_operands = 0 : i64, tpu.core_type = #tpu.core_type<tc>} {
    %c0 = arith.constant 0 : index
    %c0_0 = arith.constant 0 : index
    %0 = vector.load %arg0[%c0, %c0_0] : memref<128x128xbf16, #tpu.memory_space<vmem>>, vector<128x128xbf16>
    %c0_1 = arith.constant 0 : index
    %c0_2 = arith.constant 0 : index
    %1 = vector.load %arg1[%c0_1, %c0_2] : memref<128x128xf32, #tpu.memory_space<vmem>>, vector<128x128xf32>
    %2 = arith.truncf %1 : vector<128x128xf32> to vector<128x128xbf16>
    %c0_3 = arith.constant 0 : index
    %c0_4 = arith.constant 0 : index
    %3 = vector.load %arg2[%c0_3, %c0_4] : memref<128x128xbf16, #tpu.memory_space<vmem>>, vector<128x128xbf16>
    %cst = arith.constant dense<0.000000e+00> : vector<128x128xf32>
    %4 = tpu.matmul %2, %3, %cst {dimension_numbers = #tpu.dot_dimension_numbers<[1], [0], [0], [1], [0, 0, 1, 1], [], []>} : vector<128x128xbf16>, vector<128x128xbf16>, vector<128x128xf32> -> vector<128x128xf32>
    %5 = arith.truncf %4 : vector<128x128xf32> to vector<128x128xbf16>
    %cst_5 = arith.constant dense<0.000000e+00> : vector<128x128xf32>
    %6 = tpu.matmul %0, %5, %cst_5 {dimension_numbers = #tpu.dot_dimension_numbers<[1], [0], [0], [1], [0, 0, 1, 1], [], []>} : vector<128x128xbf16>, vector<128x128xbf16>, vector<128x128xf32> -> vector<128x128xf32>
    %c0_6 = arith.constant 0 : index
    %c0_7 = arith.constant 0 : index
    %7 = vector.load %arg5[%c0_6, %c0_7] : memref<1x128xf32, #tpu.memory_space<vmem>>, vector<1x128xf32>
    %8 = vector.broadcast %7 : vector<1x128xf32> to vector<128x128xf32>
    %9 = arith.mulf %6, %8 : vector<128x128xf32>
    %c0_8 = arith.constant 0 : index
    %c0_9 = arith.constant 0 : index
    %10 = vector.load %arg8[%c0_8, %c0_9] : memref<1x128xf32, #tpu.memory_space<vmem>>, vector<1x128xf32>
    %11 = vector.broadcast %10 : vector<1x128xf32> to vector<128x128xf32>
    %12 = arith.addf %9, %11 : vector<128x128xf32>
    %cst_10 = arith.constant 0.000000e+00 : f32
    %13 = vector.broadcast %cst_10 : f32 to vector<128x128xf32>
    %14 = arith.maximumf %12, %13 : vector<128x128xf32>
    %15 = arith.truncf %14 : vector<128x128xf32> to vector<128x128xbf16>
    %c0_11 = arith.constant 0 : index
    %c0_12 = arith.constant 0 : index
    %16 = vector.load %arg3[%c0_11, %c0_12] : memref<128x128xbf16, #tpu.memory_space<vmem>>, vector<128x128xbf16>
    %cst_13 = arith.constant dense<0.000000e+00> : vector<128x128xf32>
    %17 = tpu.matmul %15, %16, %cst_13 {dimension_numbers = #tpu.dot_dimension_numbers<[1], [0], [0], [1], [0, 0, 1, 1], [], []>} : vector<128x128xbf16>, vector<128x128xbf16>, vector<128x128xf32> -> vector<128x128xf32>
    %18 = arith.truncf %17 : vector<128x128xf32> to vector<128x128xbf16>
    %cst_14 = arith.constant dense<0.000000e+00> : vector<128x128xf32>
    %19 = tpu.matmul %0, %18, %cst_14 {dimension_numbers = #tpu.dot_dimension_numbers<[1], [0], [0], [1], [0, 0, 1, 1], [], []>} : vector<128x128xbf16>, vector<128x128xbf16>, vector<128x128xf32> -> vector<128x128xf32>
    %c0_15 = arith.constant 0 : index
    %c0_16 = arith.constant 0 : index
    %20 = vector.load %arg6[%c0_15, %c0_16] : memref<1x128xf32, #tpu.memory_space<vmem>>, vector<1x128xf32>
    %21 = vector.broadcast %20 : vector<1x128xf32> to vector<128x128xf32>
    %22 = arith.mulf %19, %21 : vector<128x128xf32>
    %c0_17 = arith.constant 0 : index
    %c0_18 = arith.constant 0 : index
    %23 = vector.load %arg9[%c0_17, %c0_18] : memref<1x128xf32, #tpu.memory_space<vmem>>, vector<1x128xf32>
    %24 = vector.broadcast %23 : vector<1x128xf32> to vector<128x128xf32>
    %25 = arith.addf %22, %24 : vector<128x128xf32>
    %cst_19 = arith.constant 0.000000e+00 : f32
    %26 = vector.broadcast %cst_19 : f32 to vector<128x128xf32>
    %27 = arith.maximumf %25, %26 : vector<128x128xf32>
    %28 = arith.truncf %27 : vector<128x128xf32> to vector<128x128xbf16>
    %c0_20 = arith.constant 0 : index
    %c0_21 = arith.constant 0 : index
    %29 = vector.load %arg4[%c0_20, %c0_21] : memref<128x128xbf16, #tpu.memory_space<vmem>>, vector<128x128xbf16>
    %cst_22 = arith.constant dense<0.000000e+00> : vector<128x128xf32>
    %30 = tpu.matmul %28, %29, %cst_22 {dimension_numbers = #tpu.dot_dimension_numbers<[1], [0], [0], [1], [0, 0, 1, 1], [], []>} : vector<128x128xbf16>, vector<128x128xbf16>, vector<128x128xf32> -> vector<128x128xf32>
    %31 = arith.truncf %30 : vector<128x128xf32> to vector<128x128xbf16>
    %cst_23 = arith.constant dense<0.000000e+00> : vector<128x128xf32>
    %32 = tpu.matmul %0, %31, %cst_23 {dimension_numbers = #tpu.dot_dimension_numbers<[1], [0], [0], [1], [0, 0, 1, 1], [], []>} : vector<128x128xbf16>, vector<128x128xbf16>, vector<128x128xf32> -> vector<128x128xf32>
    %c0_24 = arith.constant 0 : index
    %c0_25 = arith.constant 0 : index
    %33 = vector.load %arg7[%c0_24, %c0_25] : memref<1x128xf32, #tpu.memory_space<vmem>>, vector<1x128xf32>
    %34 = vector.broadcast %33 : vector<1x128xf32> to vector<128x128xf32>
    %35 = arith.mulf %32, %34 : vector<128x128xf32>
    %c0_26 = arith.constant 0 : index
    %c0_27 = arith.constant 0 : index
    %36 = vector.load %arg10[%c0_26, %c0_27] : memref<1x128xf32, #tpu.memory_space<vmem>>, vector<1x128xf32>
    %37 = vector.broadcast %36 : vector<1x128xf32> to vector<128x128xf32>
    %38 = arith.addf %35, %37 : vector<128x128xf32>
    %c0_28 = arith.constant 0 : index
    %c0_29 = arith.constant 0 : index
    %39 = vector.load %arg14[%c0_28, %c0_29] : memref<128x128xf32, #tpu.memory_space<vmem>>, vector<128x128xf32>
    tpu.vector_store %arg14[%c0_28, %c0_29], %38 {strides = array<i32>} : memref<128x128xf32, #tpu.memory_space<vmem>>, vector<128x128xf32>,
    %40 = arith.truncf %38 : vector<128x128xf32> to vector<128x128xbf16>
    %c0_30 = arith.constant 0 : index
    %c0_31 = arith.constant 0 : index
    %41 = vector.load %arg11[%c0_30, %c0_31] : memref<128x128xbf16, #tpu.memory_space<vmem>>, vector<128x128xbf16>
    %cst_32 = arith.constant dense<0.000000e+00> : vector<128x128xf32>
    %42 = tpu.matmul %40, %41, %cst_32 {dimension_numbers = #tpu.dot_dimension_numbers<[1], [0], [0], [1], [0, 0, 1, 1], [], []>} : vector<128x128xbf16>, vector<128x128xbf16>, vector<128x128xf32> -> vector<128x128xf32>
    %c0_33 = arith.constant 0 : index
    %c0_34 = arith.constant 0 : index
    %43 = vector.load %arg12[%c0_33, %c0_34] : memref<1x128xf32, #tpu.memory_space<vmem>>, vector<1x128xf32>
    %44 = vector.broadcast %43 : vector<1x128xf32> to vector<128x128xf32>
    %45 = arith.addf %42, %44 : vector<128x128xf32>
    %c0_35 = arith.constant 0 : index
    %c0_36 = arith.constant 0 : index
    %46 = vector.load %arg13[%c0_35, %c0_36] : memref<128x128xf32, #tpu.memory_space<vmem>>, vector<128x128xf32>
    tpu.vector_store %arg13[%c0_35, %c0_36], %45 {strides = array<i32>} : memref<128x128xf32, #tpu.memory_space<vmem>>, vector<128x128xf32>,
    return
  }
}

</mosaic_0001>

<bundles_post_ra>
// kernel: tpu_custom_call.1
= control target key start
LH: loop header
LB: loop body
LE: loop exit
PB: predicated region body
PF: predicated region fallthrough
CT: control target
= control target key end

     0   :  { %20 = vsyncpa [#allocation3], 0  ;;  %s1841_s0 = inlined_call_operand.hbm [shape: bf16[128,128], index: 0, kind: input, shape index: {}]   ;;  %s1842_s1 = inlined_call_operand.hbm [shape: f32[128,128], index: 1, kind: input, shape index: {}]   ;;  %s1843_s2 = inlined_call_operand.hbm [shape: bf16[128,128], index: 2, kind: input, shape index: {}]   ;;  %s1844_s3 = inlined_call_operand.hbm [shape: bf16[128,128], index: 3, kind: input, shape index: {}]   ;;  %s1845_s4 = inlined_call_operand.hbm [shape: bf16[128,128], index: 4, kind: input, shape index: {}]   ;;  %s1846_s5 = inlined_call_operand.vmem [shape: f32[1,128], index: 5, kind: input, shape index: {}]   ;;  %s1847_s6 = inlined_call_operand.vmem [shape: f32[1,128], index: 6, kind: input, shape index: {}]   ;;  %s1848_s7 = inlined_call_operand.vmem [shape: f32[1,128], index: 7, kind: input, shape index: {}]   ;;  %s1849_s8 = inlined_call_operand.vmem [shape: f32[1,128], index: 8, kind: input, shape index: {}]   ;;  %s1850_s9 = inlined_call_operand.vmem [shape: f32[1,128], index: 9, kind: input, shape index: {}]   ;;  %s1851_s10 = inlined_call_operand.vmem [shape: f32[1,128], index: 10, kind: input, shape index: {}]   ;;  %s1852_s11 = inlined_call_operand.hbm [shape: bf16[128,128], index: 11, kind: input, shape index: {}]   ;;  %s1853_s12 = inlined_call_operand.vmem [shape: f32[1,128], index: 12, kind: input, shape index: {}]   ;;  %s1854_s13 = inlined_call_operand.hbm [shape: f32[128,128], index: 13, kind: output, shape index: {0}]   ;;  %s1855_s14 = inlined_call_operand.hbm [shape: f32[128,128], index: 14, kind: output, shape index: {1}]  }
   0x1   :  { %21 = vsyncpa [#allocation6], 0 }
   0x2   :  { %22 = vsyncpa [#allocation9], 0 }
   0x3   :  { %23 = vsyncpa [#allocation12], 0 }
   0x4   :  { %24 = vsyncpa [#allocation4], 0  ;;  %s43_s15 = sshll.u32 %s1842_s1, 4  ;;  %s44_s15 = int_to_ptr.hbm [resolvable:$true] %s43_s15 }
   0x5   :  { %25 = vsyncpa [#allocation15], 0  ;;  %s1552_s16 = smov [#allocation5]   ;;  %s1553_s18 = smov 128  }
   0x6   :  { %s45_s17 = sshll.u32 %s1552_s16, 4  ;;  %s1554_s19 = smov 8   ;;  %s46_s17 = int_to_ptr.vmem [resolvable:$true] %s45_s17 }
   0x7   :  { %51 = dma.hbm_to_vmem [thread:$0]  %s44_s15, 2048, %s46_s17, [#allocation6], %s1553_s18, %s1553_s18, %s1554_s19  }
   0x8   :  { %s69_s22 = sshll.u32 %s1844_s3, 4  ;;  %s1555_s23 = smov [#allocation8]   ;;  %s70_s22 = int_to_ptr.hbm [resolvable:$true] %s69_s22 }
   0x9   :  { %s71_s24 = sshll.u32 %s1555_s23, 4  ;;  %s30_s26 = sshll.u32 %s1841_s0, 4  ;;  %s72_s24 = int_to_ptr.vmem [resolvable:$true] %s71_s24  ;;  %s31_s26 = int_to_ptr.hbm [resolvable:$true] %s30_s26 }
   0xa   :  { %s1556_s27 = smov 64   ;;  %s1557_s28 = smov 4  }
   0xb   :  { %77 = dma.hbm_to_vmem [thread:$0]  %s70_s22, 1024, %s72_s24, [#allocation9], %s1556_s27, %s1556_s27, %s1557_s28  }
   0xc   :  { %s56_s15 = sshll.u32 %s1843_s2, 4  ;;  %s1558_s16 = smov [#allocation2]   ;;  %s57_s15 = int_to_ptr.hbm [resolvable:$true] %s56_s15 }
   0xd   :  { %s32_s17 = sshll.u32 %s1558_s16, 4  ;;  %s1559_s3 = smov [#allocation7]   ;;  %s33_s17 = int_to_ptr.vmem [resolvable:$true] %s32_s17 }
   0xe   :  { %38 = dma.hbm_to_vmem [thread:$0]  %s31_s26, 1024, %s33_s17, [#allocation3], %s1556_s27, %s1556_s27, %s1557_s28  }
   0xf   :  { %s58_s20 = sshll.u32 %s1559_s3, 4  ;;  %s82_s0 = sshll.u32 %s1845_s4, 4  ;;  %s59_s20 = int_to_ptr.vmem [resolvable:$true] %s58_s20  ;;  %s83_s0 = int_to_ptr.hbm [resolvable:$true] %s82_s0 }
  0x10   :  { %64 = dma.hbm_to_vmem [thread:$0]  %s57_s15, 1024, %s59_s20, [#allocation6], %s1556_s27, %s1556_s27, %s1557_s28  }
  0x11   :  { %s107_s24 = sshll.u32 %s1852_s11, 4  ;;  %s1560_s1 = smov [#allocation10]   ;;  %s108_s24 = int_to_ptr.hbm [resolvable:$true] %s107_s24 }
  0x12   :  { %s84_s2 = sshll.u32 %s1560_s1, 4  ;;  %s1561_s29 = smov [#allocation11]   ;;  %s85_s2 = int_to_ptr.vmem [resolvable:$true] %s84_s2 }
  0x13   :  { %90 = dma.hbm_to_vmem [thread:$0]  %s83_s0, 1024, %s85_s2, [#allocation9], %s1556_s27, %s1556_s27, %s1557_s28  }
  0x14   :  { %s109_s26 = sshll.u32 %s1561_s29, 4  ;;  %s110_s26 = int_to_ptr.vmem [resolvable:$true] %s109_s26 }
  0x15   :  { %115 = dma.hbm_to_vmem [thread:$0]  %s108_s24, 1024, %s110_s26, [#allocation12], %s1556_s27, %s1556_s27, %s1557_s28  }
  0x16   :  { %1540 = dma.done.wait [#allocation3], 1024  }
  0x17   :  { %1541 = vsyncadd [#allocation3], 4294966272 }
  0x18   :  { %1542 = dma.done.wait [#allocation6], 3072  }
  0x19   :  { %1543 = vsyncadd [#allocation6], 4294964224 }
  0x1a   :  { %1544 = dma.done.wait [#allocation9], 2048  }
  0x1b   :  { %1545 = vsyncadd [#allocation9], 4294965248 }
  0x1c   :  { %1546 = dma.done.wait [#allocation12], 1024  }
  0x1d   :  { %1547 = vsyncadd [#allocation12], 4294966272  ;;  %v1280_v0 = vld [vmem:[#allocation7 + $0x38] sm:$0xff]  ;;  %v1279_v1 = vld [vmem:[#allocation7 + $0x30] sm:$0xff]  ;;  %s1084_s21 = sshll.u32 %s1855_s14, 4  ;;  %s1071_s24 = sshll.u32 %s1854_s13, 4  ;;  %s1085_s21 = int_to_ptr.hbm [resolvable:$true] %s1084_s21  ;;  %s1072_s24 = int_to_ptr.hbm [resolvable:$true] %s1071_s24 }
  0x1e   :  { %1305 = vmatpush.bf16.msra.mxu3 %v1280_v0  ;;  %246 = vmatpush.bf16.msra.mxu0 %v1280_v0  ;;  %v1278_v2 = vld [vmem:[#allocation7 + $0x28] sm:$0xff]  ;;  %v1277_v3 = vld [vmem:[#allocation7 + $0x20] sm:$0xff]  ;;  %v1276_v4 = vld [vmem:[#allocation7 + $0x18] sm:$0xff] }
  0x1f   :  { %v1275_v5 = vld [vmem:[#allocation7 + $0x10] sm:$0xff]  ;;  %v1274_v6 = vld [vmem:[#allocation7 + $0x8] sm:$0xff]  ;;  %v1273_v7 = vld [vmem:[#allocation7] sm:$0xff] }
  0x20   :  { %v162_v8 = vld [vmem:[#allocation5 + $0x20] sm:$0xff]  ;;  %v163_v9 = vld [vmem:[#allocation5 + $0x28] sm:$0xff]  ;;  %v164_v11 = vld [vmem:[#allocation5 + $0x30] sm:$0xff] }
  0x21   :  { %v176_v10 = vpack.c.bf16 %v163_v9, %v162_v8  ;;  %v165_v12 = vld [vmem:[#allocation5 + $0x38] sm:$0xff]  ;;  %v166_v14 = vld [vmem:[#allocation5 + $0x40] sm:$0xff]  ;;  %v167_v15 = vld [vmem:[#allocation5 + $0x48] sm:$0xff] }
  0x22   :  { %1306 = vmatpush.bf16.msra.mxu3 %v1279_v1  ;;  %247 = vmatpush.bf16.msra.mxu0 %v1279_v1  ;;  %v177_v13 = vpack.c.bf16 %v165_v12, %v164_v11  ;;  %v178_v16 = vpack.c.bf16 %v167_v15, %v166_v14  ;;  %v168_v17 = vld [vmem:[#allocation5 + $0x50] sm:$0xff]  ;;  %v169_v18 = vld [vmem:[#allocation5 + $0x58] sm:$0xff]  ;;  %v158_v20 = vld [vmem:[#allocation5] sm:$0xff] }
  0x23   :  { %v179_v19 = vpack.c.bf16 %v169_v18, %v168_v17  ;;  %v159_v21 = vld [vmem:[#allocation5 + $0x8] sm:$0xff]  ;;  %v170_v23 = vld [vmem:[#allocation5 + $0x60] sm:$0xff]  ;;  %v160_v26 = vld [vmem:[#allocation5 + $0x10] sm:$0xff] }
  0x24   :  { %v174_v22 = vpack.c.bf16 %v159_v21, %v158_v20  ;;  %v171_v24 = vld [vmem:[#allocation5 + $0x68] sm:$0xff]  ;;  %v161_v27 = vld [vmem:[#allocation5 + $0x18] sm:$0xff]  ;;  %v172_v29 = vld [vmem:[#allocation5 + $0x70] sm:$0xff] }
  0x25   :  { %v180_v25 = vpack.c.bf16 %v171_v24, %v170_v23  ;;  %v175_v28 = vpack.c.bf16 %v161_v27, %v160_v26  ;;  %v173_v30 = vld [vmem:[#allocation5 + $0x78] sm:$0xff]  ;;  %v1660_v56 = vld [vmem:[#allocation2 + $0x10] sm:$0xff]  ;;  %v1666_v58 = vld [vmem:[#allocation2 + $0x20] sm:$0xff] }
  0x26   :  { %1307 = vmatpush.bf16.msra.mxu3 %v1278_v2  ;;  %248 = vmatpush.bf16.msra.mxu0 %v1278_v2  ;;  %v181_v31 = vpack.c.bf16 %v173_v30, %v172_v29  ;;  %v1663_v57 = vld [vmem:[#allocation2 + $0x18] sm:$0xff]  ;;  %v1669_v59 = vld [vmem:[#allocation2] sm:$0xff]  ;;  %v1672_v60 = vld [vmem:[#allocation2 + $0x28] sm:$0xff] }
  0x27   :  { %v1675_v61 = vld [vmem:[#allocation2 + $0x8] sm:$0xff]  ;;  %v1288_v62 = vld [vmem:[#allocation8 + $0x38] sm:$0xff]  ;;  %v1287_v63 = vld [vmem:[#allocation8 + $0x30] sm:$0xff] }
  0x28   :  { %1321 = vmatpush.bf16.msra.mxu2 %v1288_v62  ;;  %v1286_v0 = vld [vmem:[#allocation8 + $0x28] sm:$0xff]  ;;  %v1285_v1 = vld [vmem:[#allocation8 + $0x20] sm:$0xff]  ;;  %v1678_v2 = vld [vmem:[#allocation2 + $0x30] sm:$0xff] }
  0x29   :  { %v1687_v9 = vld [vmem:[%s1846_s5] ss:$0 sm:$0xff] }
  0x2a   :  { %1308 = vmatpush.bf16.msra.mxu3 %v1277_v3  ;;  %249 = vmatpush.bf16.msra.mxu0 %v1277_v3  ;;  %v1681_v3 = vld [vmem:[#allocation2 + $0x38] sm:$0xff]  ;;  %v1693_v11 = vld [vmem:[%s1849_s8] ss:$0 sm:$0xff] }
  0x2c   :  { %1322 = vmatpush.bf16.msra.mxu2 %v1287_v63 }
  0x2e   :  { %1309 = vmatpush.bf16.msra.mxu3 %v1276_v4  ;;  %250 = vmatpush.bf16.msra.mxu0 %v1276_v4  ;;  %v1284_v4 = vld [vmem:[#allocation8 + $0x18] sm:$0xff] }
  0x30   :  { %1323 = vmatpush.bf16.msra.mxu2 %v1286_v0 }
  0x32   :  { %1310 = vmatpush.bf16.msra.mxu3 %v1275_v5  ;;  %251 = vmatpush.bf16.msra.mxu0 %v1275_v5  ;;  %v1283_v5 = vld [vmem:[#allocation8 + $0x10] sm:$0xff] }
  0x34   :  { %1324 = vmatpush.bf16.msra.mxu2 %v1285_v1 }
  0x36   :  { %1311 = vmatpush.bf16.msra.mxu3 %v1274_v6  ;;  %252 = vmatpush.bf16.msra.mxu0 %v1274_v6  ;;  %v1282_v6 = vld [vmem:[#allocation8 + $0x8] sm:$0xff] }
  0x38   :  { %1325 = vmatpush.bf16.msra.mxu2 %v1284_v4 }
  0x3a   :  { %1312 = vmatpush.bf16.msra.mxu3 %v1273_v7  ;;  %253 = vmatpush.bf16.msra.mxu0 %v1273_v7  ;;  %v1281_v7 = vld [vmem:[#allocation8] sm:$0xff] }
  0x3c   :  { %1326 = vmatpush.bf16.msra.mxu2 %v1283_v5 }
  0x3d   :  { %264 = vmatmul.bf16.vlgmr.msra.gmra.mxu3 %v176_v10  ;;  %254 = vmatmul.bf16.vlgmr.msra.gmra.mxu0 %v174_v22 }
  0x40   :  { %1327 = vmatpush.bf16.msra.mxu2 %v1282_v6 }
  0x44   :  { %1328 = vmatpush.bf16.msra.mxu2 %v1281_v7 }
  0x4d   :  { %269 = vmatmul.bf16.gmra.mxu3 %v177_v13  ;;  %259 = vmatmul.bf16.gmra.mxu0 %v175_v28 }
  0x5d   :  { %274 = vmatmul.bf16.gmra.mxu3 %v178_v16 }
  0x6d   :  { %279 = vmatmul.bf16.gmra.mxu3 %v179_v19 }
  0x7d   :  { %284 = vmatmul.bf16.gmra.mxu3 %v180_v25 }
  0x8d   :  { %289 = vmatmul.bf16.gmra.mxu3 %v181_v31 }
  0xba   :  { %v255_v42 = vpop.f32.mrf.mxu0 }
  0xc0   :  { %v265_v32 = vpop.f32.mrf.mxu3 }
  0xc2   :  { %v257_v46 = vpop.f32.mrf.mxu0 }
  0xc3   :  { %v295_v55 = vpack.c.bf16 %v257_v46, %v255_v42 }
  0xc8   :  { %v267_v33 = vpop.f32.mrf.mxu3 }
  0xc9   :  { %v297_v52 = vpack.c.bf16 %v267_v33, %v265_v32 }
  0xca   :  { %v260_v49 = vpop.f32.mrf.mxu0 }
  0xd0   :  { %v270_v34 = vpop.f32.mrf.mxu3 }
  0xd2   :  { %v262_v53 = vpop.f32.mrf.mxu0 }
  0xd3   :  { %v296_v54 = vpack.c.bf16 %v262_v53, %v260_v49 }
  0xd8   :  { %v272_v35 = vpop.f32.mrf.mxu3 }
  0xd9   :  { %v298_v51 = vpack.c.bf16 %v272_v35, %v270_v34 }
  0xe0   :  { %v275_v36 = vpop.f32.mrf.mxu3 }
  0xe8   :  { %v277_v37 = vpop.f32.mrf.mxu3 }
  0xe9   :  { %v299_v50 = vpack.c.bf16 %v277_v37, %v275_v36 }
  0xf0   :  { %v280_v38 = vpop.f32.mrf.mxu3 }
  0xf8   :  { %v282_v39 = vpop.f32.mrf.mxu3 }
  0xf9   :  { %v300_v48 = vpack.c.bf16 %v282_v39, %v280_v38 }
 0x100   :  { %v285_v40 = vpop.f32.mrf.mxu3 }
 0x108   :  { %v287_v41 = vpop.f32.mrf.mxu3 }
 0x109   :  { %v301_v47 = vpack.c.bf16 %v287_v41, %v285_v40 }
 0x110   :  { %v290_v43 = vpop.f32.mrf.mxu3 }
 0x118   :  { %v292_v44 = vpop.f32.mrf.mxu3 }
 0x119   :  { %v302_v45 = vpack.c.bf16 %v292_v44, %v290_v43 }
 0x11b   :  { %351 = vmatpush.bf16.msrb.mxu0 %v302_v45  ;;  %1313 = vmatpush.bf16.msra.mxu1 %v302_v45 }
 0x11f   :  { %352 = vmatpush.bf16.msrb.mxu0 %v301_v47  ;;  %1314 = vmatpush.bf16.msra.mxu1 %v301_v47 }
 0x123   :  { %353 = vmatpush.bf16.msrb.mxu0 %v300_v48  ;;  %1315 = vmatpush.bf16.msra.mxu1 %v300_v48 }
 0x127   :  { %354 = vmatpush.bf16.msrb.mxu0 %v299_v50  ;;  %1316 = vmatpush.bf16.msra.mxu1 %v299_v50 }
 0x12b   :  { %355 = vmatpush.bf16.msrb.mxu0 %v298_v51  ;;  %1317 = vmatpush.bf16.msra.mxu1 %v298_v51 }
 0x12f   :  { %356 = vmatpush.bf16.msrb.mxu0 %v297_v52  ;;  %1318 = vmatpush.bf16.msra.mxu1 %v297_v52 }
 0x133   :  { %357 = vmatpush.bf16.msrb.mxu0 %v296_v54  ;;  %1319 = vmatpush.bf16.msra.mxu1 %v296_v54 }
 0x137   :  { %358 = vmatpush.bf16.msrb.mxu0 %v295_v55  ;;  %1320 = vmatpush.bf16.msra.mxu1 %v295_v55 }
 0x13a   :  { %369 = vmatmul.bf16.vlgmr.msra.gmra.mxu1 %v1660_v56  ;;  %359 = vmatmul.bf16.vlgmr.msrb.gmra.mxu0 %v1669_v59 }
 0x13b   :  { %528 = vmatpush.bf16.msra.mxu0 %v1288_v62 }
 0x13f   :  { %529 = vmatpush.bf16.msra.mxu0 %v1287_v63 }
 0x143   :  { %530 = vmatpush.bf16.msra.mxu0 %v1286_v0 }
 0x147   :  { %531 = vmatpush.bf16.msra.mxu0 %v1285_v1 }
 0x14a   :  { %374 = vmatmul.bf16.gmra.mxu1 %v1663_v57  ;;  %364 = vmatmul.bf16.gmra.mxu0 %v1675_v61 }
 0x14b   :  { %532 = vmatpush.bf16.msra.mxu0 %v1284_v4 }
 0x14f   :  { %533 = vmatpush.bf16.msra.mxu0 %v1283_v5 }
 0x153   :  { %534 = vmatpush.bf16.msra.mxu0 %v1282_v6 }
 0x157   :  { %535 = vmatpush.bf16.msra.mxu0 %v1281_v7 }
 0x15a   :  { %379 = vmatmul.bf16.gmra.mxu1 %v1666_v58 }
 0x16a   :  { %384 = vmatmul.bf16.gmra.mxu1 %v1672_v60 }
 0x17a   :  { %389 = vmatmul.bf16.gmra.mxu1 %v1678_v2 }
 0x18a   :  { %394 = vmatmul.bf16.gmra.mxu1 %v1681_v3 }
 0x1b7   :  { %v370_v8 = vpop.f32.mrf.mxu1  ;;  %v360_v36 = vpop.f32.mrf.mxu0 }
 0x1b8   :  { %v408_v10 = vmul.f32 %v1687_v9, %v370_v8  ;;  %v404_v39 = vmul.f32 %v1687_v9, %v360_v36 }
 0x1ba   :  { %v428_v13 = vadd.f32 %v1693_v11, %v408_v10  ;;  %v424_v40 = vadd.f32 %v1693_v11, %v404_v39 }
 0x1bc   :  { %v444_v16 = vmax.f32 %v428_v13, 0.0  ;;  %v440_v45 = vmax.f32 %v424_v40, 0.0 }
 0x1bf   :  { %v372_v12 = vpop.f32.mrf.mxu1  ;;  %v362_v42 = vpop.f32.mrf.mxu0 }
 0x1c0   :  { %v409_v14 = vmul.f32 %v1687_v9, %v372_v12  ;;  %v405_v43 = vmul.f32 %v1687_v9, %v362_v42 }
 0x1c2   :  { %v429_v15 = vadd.f32 %v1693_v11, %v409_v14  ;;  %v425_v46 = vadd.f32 %v1693_v11, %v405_v43 }
 0x1c4   :  { %v445_v17 = vmax.f32 %v429_v15, 0.0  ;;  %v441_v49 = vmax.f32 %v425_v46, 0.0 }
 0x1c6   :  { %v458_v18 = vpack.c.bf16 %v445_v17, %v444_v16  ;;  %v456_v51 = vpack.c.bf16 %v441_v49, %v440_v45 }
 0x1c7   :  { %v375_v19 = vpop.f32.mrf.mxu1  ;;  %v365_v54 = vpop.f32.mrf.mxu0 }
 0x1c8   :  { %546 = vmatmul.bf16.vlgmr.msra.gmra.mxu2 %v458_v18  ;;  %v410_v20 = vmul.f32 %v1687_v9, %v375_v19  ;;  %536 = vmatmul.bf16.vlgmr.msra.gmra.mxu0 %v456_v51  ;;  %v406_v63 = vmul.f32 %v1687_v9, %v365_v54  ;;  %v1295_v51 = vld [vmem:[#allocation10 + $0x30] sm:$0xff]  ;;  %v1292_v54 = vld [vmem:[#allocation10 + $0x18] sm:$0xff] }
 0x1ca   :  { %v430_v22 = vadd.f32 %v1693_v11, %v410_v20  ;;  %v426_v0 = vadd.f32 %v1693_v11, %v406_v63  ;;  %v1289_v63 = vld [vmem:[#allocation10] sm:$0xff] }
 0x1cc   :  { %v446_v25 = vmax.f32 %v430_v22, 0.0  ;;  %v442_v7 = vmax.f32 %v426_v0, 0.0 }
 0x1cf   :  { %v377_v21 = vpop.f32.mrf.mxu1  ;;  %v367_v4 = vpop.f32.mrf.mxu0 }
 0x1d0   :  { %v411_v23 = vmul.f32 %v1687_v9, %v377_v21  ;;  %v407_v5 = vmul.f32 %v1687_v9, %v367_v4 }
 0x1d2   :  { %v431_v24 = vadd.f32 %v1693_v11, %v411_v23  ;;  %v427_v8 = vadd.f32 %v1693_v11, %v407_v5  ;;  %v1743_v5 = vld [vmem:[%s1850_s9] ss:$0 sm:$0xff] }
 0x1d4   :  { %v447_v26 = vmax.f32 %v431_v24, 0.0  ;;  %v443_v13 = vmax.f32 %v427_v8, 0.0 }
 0x1d6   :  { %v459_v27 = vpack.c.bf16 %v447_v26, %v446_v25  ;;  %v457_v15 = vpack.c.bf16 %v443_v13, %v442_v7 }
 0x1d7   :  { %v380_v28 = vpop.f32.mrf.mxu1 }
 0x1d8   :  { %551 = vmatmul.bf16.gmra.mxu2 %v459_v27  ;;  %v412_v29 = vmul.f32 %v1687_v9, %v380_v28  ;;  %541 = vmatmul.bf16.gmra.mxu0 %v457_v15 }
 0x1da   :  { %v432_v31 = vadd.f32 %v1693_v11, %v412_v29 }
 0x1dc   :  { %v448_v34 = vmax.f32 %v432_v31, 0.0 }
 0x1df   :  { %v382_v30 = vpop.f32.mrf.mxu1 }
 0x1e0   :  { %v413_v32 = vmul.f32 %v1687_v9, %v382_v30 }
 0x1e2   :  { %v433_v33 = vadd.f32 %v1693_v11, %v413_v32 }
 0x1e4   :  { %v449_v35 = vmax.f32 %v433_v33, 0.0 }
 0x1e6   :  { %v460_v37 = vpack.c.bf16 %v449_v35, %v448_v34 }
 0x1e7   :  { %v385_v38 = vpop.f32.mrf.mxu1 }
 0x1e8   :  { %556 = vmatmul.bf16.gmra.mxu2 %v460_v37  ;;  %v414_v41 = vmul.f32 %v1687_v9, %v385_v38 }
 0x1ea   :  { %v434_v47 = vadd.f32 %v1693_v11, %v414_v41 }
 0x1ec   :  { %v450_v52 = vmax.f32 %v434_v47, 0.0 }
 0x1ef   :  { %v387_v44 = vpop.f32.mrf.mxu1 }
 0x1f0   :  { %v415_v48 = vmul.f32 %v1687_v9, %v387_v44 }
 0x1f2   :  { %v435_v50 = vadd.f32 %v1693_v11, %v415_v48 }
 0x1f4   :  { %v451_v53 = vmax.f32 %v435_v50, 0.0  ;;  %v1296_v50 = vld [vmem:[#allocation10 + $0x38] sm:$0xff] }
 0x1f5   :  { %762 = vmatpush.bf16.msrb.mxu0 %v1296_v50 }
 0x1f6   :  { %v461_v55 = vpack.c.bf16 %v451_v53, %v450_v52  ;;  %v1294_v52 = vld [vmem:[#allocation10 + $0x28] sm:$0xff]  ;;  %v1293_v53 = vld [vmem:[#allocation10 + $0x20] sm:$0xff] }
 0x1f7   :  { %v390_v62 = vpop.f32.mrf.mxu1 }
 0x1f8   :  { %561 = vmatmul.bf16.gmra.mxu2 %v461_v55  ;;  %v416_v1 = vmul.f32 %v1687_v9, %v390_v62  ;;  %v1291_v55 = vld [vmem:[#allocation10 + $0x10] sm:$0xff]  ;;  %v1290_v62 = vld [vmem:[#allocation10 + $0x8] sm:$0xff] }
 0x1f9   :  { %763 = vmatpush.bf16.msrb.mxu0 %v1295_v51 }
 0x1fa   :  { %v436_v10 = vadd.f32 %v1693_v11, %v416_v1  ;;  %v1737_v1 = vld [vmem:[%s1847_s6] ss:$0 sm:$0xff] }
 0x1fc   :  { %v452_v16 = vmax.f32 %v436_v10, 0.0 }
 0x1fd   :  { %764 = vmatpush.bf16.msrb.mxu0 %v1294_v52 }
 0x1ff   :  { %v392_v6 = vpop.f32.mrf.mxu1 }
 0x200   :  { %v417_v12 = vmul.f32 %v1687_v9, %v392_v6 }
 0x201   :  { %765 = vmatpush.bf16.msrb.mxu0 %v1293_v53 }
 0x202   :  { %v437_v14 = vadd.f32 %v1693_v11, %v417_v12 }
 0x204   :  { %v453_v17 = vmax.f32 %v437_v14, 0.0 }
 0x205   :  { %766 = vmatpush.bf16.msrb.mxu0 %v1292_v54 }
 0x206   :  { %v462_v18 = vpack.c.bf16 %v453_v17, %v452_v16 }
 0x207   :  { %v395_v19 = vpop.f32.mrf.mxu1 }
 0x208   :  { %566 = vmatmul.bf16.gmra.mxu2 %v462_v18  ;;  %v418_v20 = vmul.f32 %v1687_v9, %v395_v19 }
 0x209   :  { %767 = vmatpush.bf16.msrb.mxu0 %v1291_v55 }
 0x20a   :  { %v438_v22 = vadd.f32 %v1693_v11, %v418_v20 }
 0x20c   :  { %v454_v25 = vmax.f32 %v438_v22, 0.0 }
 0x20d   :  { %768 = vmatpush.bf16.msrb.mxu0 %v1290_v62 }
 0x20f   :  { %v397_v21 = vpop.f32.mrf.mxu1 }
 0x210   :  { %v419_v23 = vmul.f32 %v1687_v9, %v397_v21 }
 0x211   :  { %769 = vmatpush.bf16.msrb.mxu0 %v1289_v63 }
 0x212   :  { %v439_v24 = vadd.f32 %v1693_v11, %v419_v23 }
 0x214   :  { %v455_v26 = vmax.f32 %v439_v24, 0.0 }
 0x216   :  { %v463_v27 = vpack.c.bf16 %v455_v26, %v454_v25 }
 0x218   :  { %571 = vmatmul.bf16.gmra.mxu2 %v463_v27 }
 0x245   :  { %v537_v38 = vpop.f32.mrf.mxu0 }
 0x24b   :  { %v547_v28 = vpop.f32.mrf.mxu2 }
 0x24d   :  { %v539_v41 = vpop.f32.mrf.mxu0 }
 0x24e   :  { %v577_v49 = vpack.c.bf16 %v539_v41, %v537_v38 }
 0x253   :  { %v549_v29 = vpop.f32.mrf.mxu2 }
 0x254   :  { %v579_v46 = vpack.c.bf16 %v549_v29, %v547_v28 }
 0x255   :  { %v542_v43 = vpop.f32.mrf.mxu0 }
 0x25b   :  { %v552_v30 = vpop.f32.mrf.mxu2 }
 0x25d   :  { %v544_v47 = vpop.f32.mrf.mxu0 }
 0x25e   :  { %v578_v48 = vpack.c.bf16 %v544_v47, %v542_v43 }
 0x263   :  { %v554_v31 = vpop.f32.mrf.mxu2 }
 0x264   :  { %v580_v45 = vpack.c.bf16 %v554_v31, %v552_v30 }
 0x26b   :  { %v557_v32 = vpop.f32.mrf.mxu2 }
 0x273   :  { %v559_v33 = vpop.f32.mrf.mxu2 }
 0x274   :  { %v581_v44 = vpack.c.bf16 %v559_v33, %v557_v32 }
 0x27b   :  { %v562_v34 = vpop.f32.mrf.mxu2 }
 0x283   :  { %v564_v35 = vpop.f32.mrf.mxu2 }
 0x284   :  { %v582_v42 = vpack.c.bf16 %v564_v35, %v562_v34 }
 0x28b   :  { %v567_v36 = vpop.f32.mrf.mxu2 }
 0x293   :  { %v569_v37 = vpop.f32.mrf.mxu2 }
 0x294   :  { %v583_v11 = vpack.c.bf16 %v569_v37, %v567_v36 }
 0x29b   :  { %v572_v39 = vpop.f32.mrf.mxu2 }
 0x2a3   :  { %v574_v40 = vpop.f32.mrf.mxu2 }
 0x2a4   :  { %v584_v9 = vpack.c.bf16 %v574_v40, %v572_v39 }
 0x2a6   :  { %585 = vmatpush.bf16.msrb.mxu3 %v584_v9 }
 0x2aa   :  { %586 = vmatpush.bf16.msrb.mxu3 %v583_v11 }
 0x2ae   :  { %587 = vmatpush.bf16.msrb.mxu3 %v582_v42 }
 0x2b2   :  { %588 = vmatpush.bf16.msrb.mxu3 %v581_v44 }
 0x2b6   :  { %589 = vmatpush.bf16.msrb.mxu3 %v580_v45 }
 0x2ba   :  { %590 = vmatpush.bf16.msrb.mxu3 %v579_v46 }
 0x2be   :  { %591 = vmatpush.bf16.msrb.mxu3 %v578_v48 }
 0x2c2   :  { %592 = vmatpush.bf16.msrb.mxu3 %v577_v49 }
 0x2c5   :  { %593 = vmatmul.bf16.vlgmr.msrb.gmra.mxu3 %v1669_v59 }
 0x2d5   :  { %598 = vmatmul.bf16.gmra.mxu3 %v1675_v61 }
 0x2e5   :  { %603 = vmatmul.bf16.gmra.mxu3 %v1660_v56 }
 0x2f5   :  { %608 = vmatmul.bf16.gmra.mxu3 %v1663_v57 }
 0x305   :  { %613 = vmatmul.bf16.gmra.mxu3 %v1666_v58 }
 0x315   :  { %618 = vmatmul.bf16.gmra.mxu3 %v1672_v60 }
 0x325   :  { %623 = vmatmul.bf16.gmra.mxu3 %v1678_v2 }
 0x335   :  { %628 = vmatmul.bf16.gmra.mxu3 %v1681_v3 }
 0x348   :  { %v594_v0 = vpop.f32.mrf.mxu3 }
 0x349   :  { %v638_v4 = vmul.f32 %v1737_v1, %v594_v0 }
 0x34b   :  { %v658_v7 = vadd.f32 %v1743_v5, %v638_v4 }
 0x34d   :  { %v674_v12 = vmax.f32 %v658_v7, 0.0 }
 0x350   :  { %v596_v6 = vpop.f32.mrf.mxu3 }
 0x351   :  { %v639_v8 = vmul.f32 %v1737_v1, %v596_v6 }
 0x353   :  { %v659_v10 = vadd.f32 %v1743_v5, %v639_v8 }
 0x355   :  { %v675_v13 = vmax.f32 %v659_v10, 0.0 }
 0x357   :  { %v690_v14 = vpack.c.bf16 %v675_v13, %v674_v12 }
 0x358   :  { %v599_v15 = vpop.f32.mrf.mxu3 }
 0x359   :  { %770 = vmatmul.bf16.vlgmr.msrb.gmra.mxu0 %v690_v14  ;;  %v640_v16 = vmul.f32 %v1737_v1, %v599_v15 }
 0x35b   :  { %v660_v18 = vadd.f32 %v1743_v5, %v640_v16 }
 0x35d   :  { %v676_v21 = vmax.f32 %v660_v18, 0.0 }
 0x360   :  { %v601_v17 = vpop.f32.mrf.mxu3 }
 0x361   :  { %v641_v19 = vmul.f32 %v1737_v1, %v601_v17 }
 0x363   :  { %v661_v20 = vadd.f32 %v1743_v5, %v641_v19 }
 0x365   :  { %v677_v22 = vmax.f32 %v661_v20, 0.0 }
 0x367   :  { %v691_v23 = vpack.c.bf16 %v677_v22, %v676_v21 }
 0x368   :  { %v604_v24 = vpop.f32.mrf.mxu3 }
 0x369   :  { %775 = vmatmul.bf16.gmra.mxu0 %v691_v23  ;;  %v642_v25 = vmul.f32 %v1737_v1, %v604_v24 }
 0x36b   :  { %v662_v27 = vadd.f32 %v1743_v5, %v642_v25 }
 0x36d   :  { %v678_v30 = vmax.f32 %v662_v27, 0.0 }
 0x370   :  { %v606_v26 = vpop.f32.mrf.mxu3 }
 0x371   :  { %v643_v28 = vmul.f32 %v1737_v1, %v606_v26 }
 0x373   :  { %v663_v29 = vadd.f32 %v1743_v5, %v643_v28 }
 0x375   :  { %v679_v31 = vmax.f32 %v663_v29, 0.0 }
 0x377   :  { %v692_v32 = vpack.c.bf16 %v679_v31, %v678_v30 }
 0x378   :  { %v609_v33 = vpop.f32.mrf.mxu3 }
 0x379   :  { %780 = vmatmul.bf16.gmra.mxu0 %v692_v32  ;;  %v644_v34 = vmul.f32 %v1737_v1, %v609_v33 }
 0x37b   :  { %v664_v36 = vadd.f32 %v1743_v5, %v644_v34 }
 0x37d   :  { %v680_v39 = vmax.f32 %v664_v36, 0.0 }
 0x380   :  { %v611_v35 = vpop.f32.mrf.mxu3 }
 0x381   :  { %v645_v37 = vmul.f32 %v1737_v1, %v611_v35 }
 0x383   :  { %v665_v38 = vadd.f32 %v1743_v5, %v645_v37 }
 0x385   :  { %v681_v40 = vmax.f32 %v665_v38, 0.0 }
 0x387   :  { %v693_v9 = vpack.c.bf16 %v681_v40, %v680_v39 }
 0x388   :  { %v614_v41 = vpop.f32.mrf.mxu3 }
 0x389   :  { %785 = vmatmul.bf16.gmra.mxu0 %v693_v9  ;;  %v646_v11 = vmul.f32 %v1737_v1, %v614_v41 }
 0x38b   :  { %v666_v43 = vadd.f32 %v1743_v5, %v646_v11 }
 0x38d   :  { %v682_v46 = vmax.f32 %v666_v43, 0.0 }
 0x390   :  { %v616_v42 = vpop.f32.mrf.mxu3 }
 0x391   :  { %v647_v44 = vmul.f32 %v1737_v1, %v616_v42 }
 0x393   :  { %v667_v45 = vadd.f32 %v1743_v5, %v647_v44  ;;  %v1304_v44 = vld [vmem:[#allocation11 + $0x38] sm:$0xff] }
 0x394   :  { %1000 = vmatpush.bf16.msrb.mxu2 %v1304_v44 }
 0x395   :  { %v683_v47 = vmax.f32 %v667_v45, 0.0  ;;  %v1303_v45 = vld [vmem:[#allocation11 + $0x30] sm:$0xff] }
 0x397   :  { %v694_v48 = vpack.c.bf16 %v683_v47, %v682_v46  ;;  %v1302_v46 = vld [vmem:[#allocation11 + $0x28] sm:$0xff]  ;;  %v1301_v47 = vld [vmem:[#allocation11 + $0x20] sm:$0xff] }
 0x398   :  { %v619_v49 = vpop.f32.mrf.mxu3  ;;  %1001 = vmatpush.bf16.msrb.mxu2 %v1303_v45 }
 0x399   :  { %790 = vmatmul.bf16.gmra.mxu0 %v694_v48  ;;  %v648_v50 = vmul.f32 %v1737_v1, %v619_v49  ;;  %v1300_v48 = vld [vmem:[#allocation11 + $0x18] sm:$0xff] }
 0x39b   :  { %v668_v52 = vadd.f32 %v1743_v5, %v648_v50 }
 0x39c   :  { %1002 = vmatpush.bf16.msrb.mxu2 %v1302_v46  ;;  %v1347_v46 = vld [vmem:[%s1853_s12] ss:$0 sm:$0xff]  ;;  %s1563_s12 = smov [#allocation13]  }
 0x39d   :  { %v684_v55 = vmax.f32 %v668_v52, 0.0  ;;  %s1069_s14 = sshll.u32 %s1563_s12, 4  ;;  %s1070_s14 = int_to_ptr.vmem [resolvable:$true] %s1069_s14 }
 0x3a0   :  { %v621_v51 = vpop.f32.mrf.mxu3  ;;  %1003 = vmatpush.bf16.msrb.mxu2 %v1301_v47 }
 0x3a1   :  { %v649_v53 = vmul.f32 %v1737_v1, %v621_v51 }
 0x3a3   :  { %v669_v54 = vadd.f32 %v1743_v5, %v649_v53 }
 0x3a4   :  { %1004 = vmatpush.bf16.msrb.mxu2 %v1300_v48 }
 0x3a5   :  { %v685_v62 = vmax.f32 %v669_v54, 0.0 }
 0x3a7   :  { %v695_v63 = vpack.c.bf16 %v685_v62, %v684_v55 }
 0x3a8   :  { %v624_v0 = vpop.f32.mrf.mxu3 }
 0x3a9   :  { %795 = vmatmul.bf16.gmra.mxu0 %v695_v63  ;;  %v650_v4 = vmul.f32 %v1737_v1, %v624_v0 }
 0x3ab   :  { %v670_v7 = vadd.f32 %v1743_v5, %v650_v4 }
 0x3ad   :  { %v686_v12 = vmax.f32 %v670_v7, 0.0 }
 0x3b0   :  { %v626_v6 = vpop.f32.mrf.mxu3 }
 0x3b1   :  { %v651_v8 = vmul.f32 %v1737_v1, %v626_v6 }
 0x3b3   :  { %v671_v10 = vadd.f32 %v1743_v5, %v651_v8 }
 0x3b5   :  { %v687_v13 = vmax.f32 %v671_v10, 0.0 }
 0x3b7   :  { %v696_v14 = vpack.c.bf16 %v687_v13, %v686_v12 }
 0x3b8   :  { %v629_v15 = vpop.f32.mrf.mxu3 }
 0x3b9   :  { %800 = vmatmul.bf16.gmra.mxu0 %v696_v14  ;;  %v652_v16 = vmul.f32 %v1737_v1, %v629_v15 }
 0x3bb   :  { %v672_v18 = vadd.f32 %v1743_v5, %v652_v16 }
 0x3bd   :  { %v688_v21 = vmax.f32 %v672_v18, 0.0 }
 0x3c0   :  { %v631_v17 = vpop.f32.mrf.mxu3 }
 0x3c1   :  { %v653_v19 = vmul.f32 %v1737_v1, %v631_v17 }
 0x3c3   :  { %v673_v20 = vadd.f32 %v1743_v5, %v653_v19 }
 0x3c5   :  { %v689_v22 = vmax.f32 %v673_v20, 0.0 }
 0x3c7   :  { %v697_v23 = vpack.c.bf16 %v689_v22, %v688_v21 }
 0x3c9   :  { %805 = vmatmul.bf16.gmra.mxu0 %v697_v23 }
 0x3d6   :  { %v771_v24 = vpop.f32.mrf.mxu0 }
 0x3de   :  { %v773_v25 = vpop.f32.mrf.mxu0 }
 0x3df   :  { %v811_v26 = vpack.c.bf16 %v773_v25, %v771_v24 }
 0x3e6   :  { %v776_v27 = vpop.f32.mrf.mxu0 }
 0x3ee   :  { %v778_v28 = vpop.f32.mrf.mxu0 }
 0x3ef   :  { %v812_v29 = vpack.c.bf16 %v778_v28, %v776_v27 }
 0x3f6   :  { %v781_v30 = vpop.f32.mrf.mxu0 }
 0x3fe   :  { %v783_v31 = vpop.f32.mrf.mxu0 }
 0x3ff   :  { %v813_v32 = vpack.c.bf16 %v783_v31, %v781_v30 }
 0x406   :  { %v786_v33 = vpop.f32.mrf.mxu0 }
 0x40e   :  { %v788_v34 = vpop.f32.mrf.mxu0 }
 0x40f   :  { %v814_v35 = vpack.c.bf16 %v788_v34, %v786_v33 }
 0x416   :  { %v791_v36 = vpop.f32.mrf.mxu0 }
 0x41e   :  { %v793_v1 = vpop.f32.mrf.mxu0 }
 0x41f   :  { %v815_v43 = vpack.c.bf16 %v793_v1, %v791_v36 }
 0x426   :  { %v796_v37 = vpop.f32.mrf.mxu0 }
 0x42e   :  { %v798_v5 = vpop.f32.mrf.mxu0 }
 0x42f   :  { %v816_v42 = vpack.c.bf16 %v798_v5, %v796_v37 }
 0x436   :  { %v801_v38 = vpop.f32.mrf.mxu0 }
 0x43e   :  { %v803_v39 = vpop.f32.mrf.mxu0 }
 0x43f   :  { %v817_v11 = vpack.c.bf16 %v803_v39, %v801_v38 }
 0x446   :  { %v806_v40 = vpop.f32.mrf.mxu0 }
 0x44e   :  { %v808_v9 = vpop.f32.mrf.mxu0 }
 0x44f   :  { %v818_v41 = vpack.c.bf16 %v808_v9, %v806_v40 }
 0x451   :  { %819 = vmatpush.bf16.msrb.mxu1 %v818_v41 }
 0x455   :  { %820 = vmatpush.bf16.msrb.mxu1 %v817_v11 }
 0x459   :  { %821 = vmatpush.bf16.msrb.mxu1 %v816_v42 }
 0x45d   :  { %822 = vmatpush.bf16.msrb.mxu1 %v815_v43 }
 0x461   :  { %823 = vmatpush.bf16.msrb.mxu1 %v814_v35 }
 0x465   :  { %824 = vmatpush.bf16.msrb.mxu1 %v813_v32 }
 0x469   :  { %825 = vmatpush.bf16.msrb.mxu1 %v812_v29 }
 0x46d   :  { %826 = vmatpush.bf16.msrb.mxu1 %v811_v26 }
 0x470   :  { %827 = vmatmul.bf16.vlgmr.msrb.gmra.mxu1 %v1669_v59  ;;  %v1299_v59 = vld [vmem:[#allocation11 + $0x10] sm:$0xff] }
 0x471   :  { %1005 = vmatpush.bf16.msrb.mxu2 %v1299_v59 }
 0x480   :  { %832 = vmatmul.bf16.gmra.mxu1 %v1675_v61  ;;  %v1298_v61 = vld [vmem:[#allocation11 + $0x8] sm:$0xff] }
 0x481   :  { %1006 = vmatpush.bf16.msrb.mxu2 %v1298_v61 }
 0x490   :  { %837 = vmatmul.bf16.gmra.mxu1 %v1660_v56  ;;  %v1297_v56 = vld [vmem:[#allocation11] sm:$0xff] }
 0x491   :  { %1007 = vmatpush.bf16.msrb.mxu2 %v1297_v56 }
 0x4a0   :  { %842 = vmatmul.bf16.gmra.mxu1 %v1663_v57  ;;  %v1787_v57 = vld [vmem:[%s1848_s7] ss:$0 sm:$0xff]  ;;  %s1562_s7 = smov [#allocation14]  }
 0x4b0   :  { %847 = vmatmul.bf16.gmra.mxu1 %v1666_v58  ;;  %v1792_v58 = vld [vmem:[%s1851_s10] ss:$0 sm:$0xff]  ;;  %s1082_s10 = sshll.u32 %s1562_s7, 4  ;;  %s1083_s10 = int_to_ptr.vmem [resolvable:$true] %s1082_s10 }
 0x4c0   :  { %852 = vmatmul.bf16.gmra.mxu1 %v1672_v60 }
 0x4d0   :  { %857 = vmatmul.bf16.gmra.mxu1 %v1678_v2 }
 0x4e0   :  { %862 = vmatmul.bf16.gmra.mxu1 %v1681_v3 }
 0x4ed   :  { %v828_v60 = vpop.f32.mrf.mxu1 }
 0x4ee   :  { %v872_v49 = vmul.f32 %v1787_v57, %v828_v60 }
 0x4f0   :  { %v892_v2 = vadd.f32 %v1792_v58, %v872_v49 }
 0x4f2   :  { %908 = vst [vmem:[#allocation14] sm:$0xff] %v892_v2 }
 0x4f5   :  { %v830_v50 = vpop.f32.mrf.mxu1 }
 0x4f6   :  { %v873_v51 = vmul.f32 %v1787_v57, %v830_v50 }
 0x4f8   :  { %v893_v3 = vadd.f32 %v1792_v58, %v873_v51 }
 0x4fa   :  { %909 = vst [vmem:[#allocation14 + $0x8] sm:$0xff] %v893_v3  ;;  %v924_v52 = vpack.c.bf16 %v893_v3, %v892_v2 }
 0x4fc   :  { %1008 = vmatmul.bf16.vlgmr.msrb.gmra.mxu2 %v924_v52 }
 0x4fd   :  { %v833_v53 = vpop.f32.mrf.mxu1 }
 0x4fe   :  { %v874_v54 = vmul.f32 %v1787_v57, %v833_v53 }
 0x500   :  { %v894_v55 = vadd.f32 %v1792_v58, %v874_v54 }
 0x502   :  { %910 = vst [vmem:[#allocation14 + $0x10] sm:$0xff] %v894_v55 }
 0x505   :  { %v835_v62 = vpop.f32.mrf.mxu1 }
 0x506   :  { %v875_v63 = vmul.f32 %v1787_v57, %v835_v62 }
 0x508   :  { %v895_v0 = vadd.f32 %v1792_v58, %v875_v63 }
 0x50a   :  { %911 = vst [vmem:[#allocation14 + $0x18] sm:$0xff] %v895_v0  ;;  %v925_v4 = vpack.c.bf16 %v895_v0, %v894_v55 }
 0x50c   :  { %1013 = vmatmul.bf16.gmra.mxu2 %v925_v4 }
 0x50d   :  { %v838_v6 = vpop.f32.mrf.mxu1 }
 0x50e   :  { %v876_v7 = vmul.f32 %v1787_v57, %v838_v6 }
 0x510   :  { %v896_v8 = vadd.f32 %v1792_v58, %v876_v7 }
 0x512   :  { %912 = vst [vmem:[#allocation14 + $0x20] sm:$0xff] %v896_v8 }
 0x515   :  { %v840_v10 = vpop.f32.mrf.mxu1 }
 0x516   :  { %v877_v12 = vmul.f32 %v1787_v57, %v840_v10 }
 0x518   :  { %v897_v13 = vadd.f32 %v1792_v58, %v877_v12 }
 0x51a   :  { %913 = vst [vmem:[#allocation14 + $0x28] sm:$0xff] %v897_v13  ;;  %v926_v14 = vpack.c.bf16 %v897_v13, %v896_v8 }
 0x51c   :  { %1018 = vmatmul.bf16.gmra.mxu2 %v926_v14 }
 0x51d   :  { %v843_v15 = vpop.f32.mrf.mxu1 }
 0x51e   :  { %v878_v16 = vmul.f32 %v1787_v57, %v843_v15 }
 0x520   :  { %v898_v17 = vadd.f32 %v1792_v58, %v878_v16 }
 0x522   :  { %914 = vst [vmem:[#allocation14 + $0x30] sm:$0xff] %v898_v17 }
 0x525   :  { %v845_v18 = vpop.f32.mrf.mxu1 }
 0x526   :  { %v879_v19 = vmul.f32 %v1787_v57, %v845_v18 }
 0x528   :  { %v899_v20 = vadd.f32 %v1792_v58, %v879_v19 }
 0x52a   :  { %915 = vst [vmem:[#allocation14 + $0x38] sm:$0xff] %v899_v20  ;;  %v927_v21 = vpack.c.bf16 %v899_v20, %v898_v17 }
 0x52c   :  { %1023 = vmatmul.bf16.gmra.mxu2 %v927_v21 }
 0x52d   :  { %v848_v22 = vpop.f32.mrf.mxu1 }
 0x52e   :  { %v880_v23 = vmul.f32 %v1787_v57, %v848_v22 }
 0x530   :  { %v900_v24 = vadd.f32 %v1792_v58, %v880_v23 }
 0x532   :  { %916 = vst [vmem:[#allocation14 + $0x40] sm:$0xff] %v900_v24 }
 0x535   :  { %v850_v25 = vpop.f32.mrf.mxu1 }
 0x536   :  { %v881_v26 = vmul.f32 %v1787_v57, %v850_v25 }
 0x538   :  { %v901_v27 = vadd.f32 %v1792_v58, %v881_v26 }
 0x53a   :  { %917 = vst [vmem:[#allocation14 + $0x48] sm:$0xff] %v901_v27  ;;  %v928_v28 = vpack.c.bf16 %v901_v27, %v900_v24 }
 0x53c   :  { %1028 = vmatmul.bf16.gmra.mxu2 %v928_v28 }
 0x53d   :  { %v853_v29 = vpop.f32.mrf.mxu1 }
 0x53e   :  { %v882_v30 = vmul.f32 %v1787_v57, %v853_v29 }
 0x540   :  { %v902_v31 = vadd.f32 %v1792_v58, %v882_v30 }
 0x542   :  { %918 = vst [vmem:[#allocation14 + $0x50] sm:$0xff] %v902_v31 }
 0x545   :  { %v855_v32 = vpop.f32.mrf.mxu1 }
 0x546   :  { %v883_v33 = vmul.f32 %v1787_v57, %v855_v32 }
 0x548   :  { %v903_v34 = vadd.f32 %v1792_v58, %v883_v33 }
 0x54a   :  { %919 = vst [vmem:[#allocation14 + $0x58] sm:$0xff] %v903_v34  ;;  %v929_v35 = vpack.c.bf16 %v903_v34, %v902_v31 }
 0x54c   :  { %1033 = vmatmul.bf16.gmra.mxu2 %v929_v35 }
 0x54d   :  { %v858_v36 = vpop.f32.mrf.mxu1 }
 0x54e   :  { %v884_v1 = vmul.f32 %v1787_v57, %v858_v36 }
 0x550   :  { %v904_v37 = vadd.f32 %v1792_v58, %v884_v1 }
 0x552   :  { %920 = vst [vmem:[#allocation14 + $0x60] sm:$0xff] %v904_v37 }
 0x555   :  { %v860_v5 = vpop.f32.mrf.mxu1 }
 0x556   :  { %v885_v38 = vmul.f32 %v1787_v57, %v860_v5 }
 0x558   :  { %v905_v39 = vadd.f32 %v1792_v58, %v885_v38 }
 0x55a   :  { %921 = vst [vmem:[#allocation14 + $0x68] sm:$0xff] %v905_v39  ;;  %v930_v40 = vpack.c.bf16 %v905_v39, %v904_v37 }
 0x55c   :  { %1038 = vmatmul.bf16.gmra.mxu2 %v930_v40 }
 0x55d   :  { %v863_v9 = vpop.f32.mrf.mxu1 }
 0x55e   :  { %v886_v41 = vmul.f32 %v1787_v57, %v863_v9 }
 0x560   :  { %v906_v11 = vadd.f32 %v1792_v58, %v886_v41 }
 0x562   :  { %922 = vst [vmem:[#allocation14 + $0x70] sm:$0xff] %v906_v11 }
 0x565   :  { %v865_v42 = vpop.f32.mrf.mxu1 }
 0x566   :  { %v887_v43 = vmul.f32 %v1787_v57, %v865_v42 }
 0x568   :  { %v907_v44 = vadd.f32 %v1792_v58, %v887_v43 }
 0x56a   :  { %923 = vst [vmem:[#allocation14 + $0x78] sm:$0xff] %v907_v44  ;;  %v931_v45 = vpack.c.bf16 %v907_v44, %v906_v11 }
 0x56b   :  { %1090 = dma.vmem_to_hbm [thread:$0]  %s1083_s10, 2048, %s1085_s21, [#allocation15], %s1553_s18, %s1553_s18, %s1554_s19  }
 0x56c   :  { %1043 = vmatmul.bf16.gmra.mxu2 %v931_v45 }
 0x57f   :  { %v1009_v47 = vpop.f32.mrf.mxu2 }
 0x580   :  { %v1010_v48 = vadd.f32 %v1347_v46, %v1009_v47 }
 0x582   :  { %1049 = vst [vmem:[#allocation13] sm:$0xff] %v1010_v48 }
 0x587   :  { %v1011_v59 = vpop.f32.mrf.mxu2 }
 0x588   :  { %v1012_v61 = vadd.f32 %v1347_v46, %v1011_v59 }
 0x58a   :  { %1050 = vst [vmem:[#allocation13 + $0x8] sm:$0xff] %v1012_v61 }
 0x58f   :  { %v1014_v56 = vpop.f32.mrf.mxu2 }
 0x590   :  { %v1015_v57 = vadd.f32 %v1347_v46, %v1014_v56 }
 0x592   :  { %1051 = vst [vmem:[#allocation13 + $0x10] sm:$0xff] %v1015_v57 }
 0x597   :  { %v1016_v58 = vpop.f32.mrf.mxu2 }
 0x598   :  { %v1017_v60 = vadd.f32 %v1347_v46, %v1016_v58 }
 0x59a   :  { %1052 = vst [vmem:[#allocation13 + $0x18] sm:$0xff] %v1017_v60 }
 0x59f   :  { %v1019_v49 = vpop.f32.mrf.mxu2 }
 0x5a0   :  { %v1020_v2 = vadd.f32 %v1347_v46, %v1019_v49 }
 0x5a2   :  { %1053 = vst [vmem:[#allocation13 + $0x20] sm:$0xff] %v1020_v2 }
 0x5a7   :  { %v1021_v50 = vpop.f32.mrf.mxu2 }
 0x5a8   :  { %v1022_v51 = vadd.f32 %v1347_v46, %v1021_v50 }
 0x5aa   :  { %1054 = vst [vmem:[#allocation13 + $0x28] sm:$0xff] %v1022_v51 }
 0x5af   :  { %v1024_v3 = vpop.f32.mrf.mxu2 }
 0x5b0   :  { %v1025_v52 = vadd.f32 %v1347_v46, %v1024_v3 }
 0x5b2   :  { %1055 = vst [vmem:[#allocation13 + $0x30] sm:$0xff] %v1025_v52 }
 0x5b7   :  { %v1026_v53 = vpop.f32.mrf.mxu2 }
 0x5b8   :  { %v1027_v54 = vadd.f32 %v1347_v46, %v1026_v53 }
 0x5ba   :  { %1056 = vst [vmem:[#allocation13 + $0x38] sm:$0xff] %v1027_v54 }
 0x5bf   :  { %v1029_v55 = vpop.f32.mrf.mxu2 }
 0x5c0   :  { %v1030_v62 = vadd.f32 %v1347_v46, %v1029_v55 }
 0x5c2   :  { %1057 = vst [vmem:[#allocation13 + $0x40] sm:$0xff] %v1030_v62 }
 0x5c7   :  { %v1031_v63 = vpop.f32.mrf.mxu2 }
 0x5c8   :  { %v1032_v0 = vadd.f32 %v1347_v46, %v1031_v63 }
 0x5ca   :  { %1058 = vst [vmem:[#allocation13 + $0x48] sm:$0xff] %v1032_v0 }
 0x5cf   :  { %v1034_v4 = vpop.f32.mrf.mxu2 }
 0x5d0   :  { %v1035_v6 = vadd.f32 %v1347_v46, %v1034_v4 }
 0x5d2   :  { %1059 = vst [vmem:[#allocation13 + $0x50] sm:$0xff] %v1035_v6 }
 0x5d7   :  { %v1036_v7 = vpop.f32.mrf.mxu2 }
 0x5d8   :  { %v1037_v8 = vadd.f32 %v1347_v46, %v1036_v7 }
 0x5da   :  { %1060 = vst [vmem:[#allocation13 + $0x58] sm:$0xff] %v1037_v8 }
 0x5df   :  { %v1039_v10 = vpop.f32.mrf.mxu2 }
 0x5e0   :  { %v1040_v12 = vadd.f32 %v1347_v46, %v1039_v10 }
 0x5e2   :  { %1061 = vst [vmem:[#allocation13 + $0x60] sm:$0xff] %v1040_v12 }
 0x5e7   :  { %v1041_v13 = vpop.f32.mrf.mxu2 }
 0x5e8   :  { %v1042_v14 = vadd.f32 %v1347_v46, %v1041_v13 }
 0x5ea   :  { %1062 = vst [vmem:[#allocation13 + $0x68] sm:$0xff] %v1042_v14 }
 0x5ef   :  { %v1044_v15 = vpop.f32.mrf.mxu2 }
 0x5f0   :  { %v1045_v16 = vadd.f32 %v1347_v46, %v1044_v15 }
 0x5f2   :  { %1063 = vst [vmem:[#allocation13 + $0x70] sm:$0xff] %v1045_v16 }
 0x5f7   :  { %v1046_v17 = vpop.f32.mrf.mxu2 }
 0x5f8   :  { %v1047_v18 = vadd.f32 %v1347_v46, %v1046_v17 }
 0x5fa   :  { %1064 = vst [vmem:[#allocation13 + $0x78] sm:$0xff] %v1047_v18 }
 0x5fb   :  { %1077 = dma.vmem_to_hbm [thread:$0]  %s1070_s14, 2048, %s1072_s24, [#allocation4], %s1553_s18, %s1553_s18, %s1554_s19  }
 0x5fc   :  { %1548 = dma.done.wait [#allocation4], 2048  }
 0x5fd   :  { %1549 = vsyncadd [#allocation4], 4294965248 }
 0x5fe   :  { %1550 = dma.done.wait [#allocation15], 2048  }
 0x5ff   :  { %1551 = vsyncadd [#allocation15], 4294965248 }
 0x600   :  { %1099 = vsyncpa [#allocation3], 1 }
 0x601   :  { %1100 = vsyncpa [#allocation6], 1 }
 0x602   :  { %1101 = vsyncpa [#allocation9], 1 }
 0x603   :  { %1102 = vsyncpa [#allocation12], 1 }
 0x604   :  { %1103 = vsyncpa [#allocation4], 1 }
 0x605   :  { %1104 = vsyncpa [#allocation15], 1 }

</bundles_post_ra>
